<compile_context>
chip_gen: v7x
topology: tpu7x:2x2x1
jax: 0.10.0
libtpu: 0.0.40
codegen_flags: <defaults>
</compile_context>

<pallas_src>
import jax
import jax.numpy as jnp
from jax.experimental import pallas as pl
from jax.experimental.pallas import tpu as pltpu


# --------------------------------------------------------------------------
# Model hyper-parameters (scaled-down but structurally identical to the
# PyTorch module: smiles_max_len=100, af2_max_len=1390, hidden 10000/1024,
# condition_latent_dim=128, vae latent_size from the SmilesVAE config).
# --------------------------------------------------------------------------
SMILES_MAX_LEN = 8        # PyTorch default: 100
AF2_MAX_LEN = 32          # PyTorch default: 1390
FLAT_DIM = SMILES_MAX_LEN * AF2_MAX_LEN   # mlp_attention_compressor input
HID1 = 256                # PyTorch: 10000
HID2 = 128                # PyTorch: 1024
COND_LATENT = 32          # condition_latent_dim (PyTorch default 128)
VAE_LATENT = 16           # smiles_vae.config['latent_size']
CONCAT = VAE_LATENT + COND_LATENT
DEC = CONCAT // 3
ZD1 = CONCAT - DEC        # z_dnn layer 1 out
ZD2 = CONCAT - 2 * DEC    # z_dnn layer 2 out
BATCH = 2

# Tile sizes for the streamed w1 GEMM (toy scale; see header for production).
TK = 128
TN = 128


def _round_up(x, m):
    return (x + m - 1) // m * m


FLAT_PAD = _round_up(FLAT_DIM, TK)
HID1_PAD = _round_up(HID1, TN)
OUT_W = _round_up(COND_LATENT + VAE_LATENT, 128)   # lane-dense output slab
B_PAD = _round_up(max(BATCH, 8), 8)                # f32 sublane alignment


# --------------------------------------------------------------------------
# Kernel A: first compressor layer  h1 = relu(x @ w1 + b1)
# Grid (HID1_PAD/TN, FLAT_PAD/TK); K (reduction) axis innermost/"arbitrary",
# N axis "parallel" (sharded across TensorCores on v7x megacore).
# x and b1 are fully VMEM-resident; only w1 is streamed tile-by-tile.
# --------------------------------------------------------------------------
def _compressor_l1_kernel(x_ref, w1_ref, b1_ref, h1_ref, acc_ref):
    j = pl.program_id(0)
    k = pl.program_id(1)

    @pl.when(k == 0)
    def _():
        acc_ref[...] = jnp.zeros_like(acc_ref)

    kk = pl.multiple_of(k * TK, TK)
    acc_ref[...] += jnp.dot(x_ref[:, pl.ds(kk, TK)], w1_ref[...],
                            preferred_element_type=jnp.float32)

    @pl.when(k == pl.num_programs(1) - 1)
    def _():
        jj = pl.multiple_of(j * TN, TN)
        bias = b1_ref[:, pl.ds(jj, TN)]
        h1_ref[...] = jnp.maximum(acc_ref[...] + bias, 0.0).astype(h1_ref.dtype)


# --------------------------------------------------------------------------
# Kernel B: fused tail — compressor layers 2/3, concat (as split-weight sum),
# and the three z_dnn linears.  Single grid point; everything fits VMEM even
# at production scale (w2 is ~20 MB bf16).
# --------------------------------------------------------------------------
def _cvae_tail_kernel(h1_ref, zvae_ref, w2_ref, b2_ref, w3_ref, b3_ref,
                      zw1v_ref, zw1c_ref, zb1_ref, zw2_ref, zb2_ref,
                      zw3_ref, zb3_ref, out_ref):
    h1 = h1_ref[...]                                           # (B_PAD, HID1_PAD) bf16
    h2 = jnp.dot(h1, w2_ref[...], preferred_element_type=jnp.float32) + b2_ref[...]
    h2 = jnp.maximum(h2, 0.0)
    z_cond = jnp.dot(h2, w3_ref[...],
                     preferred_element_type=jnp.float32) + b3_ref[...]

    # z_concat = [z_vae, z_cond]; concat-then-matmul == split-weight sum.
    z_vae = zvae_ref[...]
    h1z = (jnp.dot(z_vae, zw1v_ref[...], preferred_element_type=jnp.float32)
           + jnp.dot(z_cond, zw1c_ref[...], preferred_element_type=jnp.float32)
           + zb1_ref[...])
    h2z = jnp.dot(h1z, zw2_ref[...], preferred_element_type=jnp.float32) + zb2_ref[...]
    z = jnp.dot(h2z, zw3_ref[...], preferred_element_type=jnp.float32) + zb3_ref[...]

    # Lane-dense output slab without jnp.concatenate: zero once, then store
    # z_cond / z into their lane ranges.
    out_ref[...] = jnp.zeros_like(out_ref)
    out_ref[:, :COND_LATENT] = z_cond.astype(out_ref.dtype)
    out_ref[:, COND_LATENT:COND_LATENT + VAE_LATENT] = z.astype(out_ref.dtype)


# --------------------------------------------------------------------------
# One-time (model-load) parameter prep: pad + cast the streamed weights once,
# NOT in the per-call forward path.
# --------------------------------------------------------------------------
def prepare_params(params):
    w1 = jnp.pad(params["w1"],
                 ((0, FLAT_PAD - FLAT_DIM), (0, HID1_PAD - HID1))
                 ).astype(jnp.bfloat16)
    b1 = jnp.pad(params["b1"], ((0, 0), (0, HID1_PAD - HID1)))
    w2 = jnp.pad(params["w2"],
                 ((0, HID1_PAD - HID1), (0, 0))).astype(jnp.bfloat16)
    prepped = dict(params)
    prepped.update(w1=w1, b1=b1, w2=w2)
    return prepped


# --------------------------------------------------------------------------
# JAX wrapper (forward head)
# --------------------------------------------------------------------------
def decoder_only_cvae_head(cross_attn_wts, z_vae, prepped):
    """cross_attn_wts: (B, S, A) f32; z_vae: (B, VAE_LATENT) f32.
    `prepped` comes from prepare_params().
    Returns (z_condition (B, COND_LATENT), z (B, VAE_LATENT))."""
    B = cross_attn_wts.shape[0]
    attn_flat = cross_attn_wts.reshape(B, -1)          # .flatten(start_dim=1)
    flat = attn_flat.shape[1]

    # x is tiny (<1 MB even at production); pad batch to a full sublane group
    # so the w1 stream is amortized over unmasked rows.
    x = jnp.pad(attn_flat,
                ((0, B_PAD - B), (0, FLAT_PAD - flat))).astype(jnp.bfloat16)
    z_vae_p = jnp.pad(z_vae, ((0, B_PAD - B), (0, 0)))

    w1 = prepped["w1"]
    b1 = prepped["b1"]
    w2 = prepped["w2"]

    nj = pl.cdiv(HID1_PAD, TN)
    nk = pl.cdiv(FLAT_PAD, TK)

    # x/b1 are resident (DMA'd once thanks to the constant index_map); w1 is
    # streamed once; h1 written once.
    cost1 = pl.CostEstimate(
        flops=2 * B_PAD * FLAT_PAD * HID1_PAD,
        transcendentals=0,
        bytes_accessed=int(x.size * 2 + w1.size * 2 + b1.size * 4
                           + B_PAD * HID1_PAD * 2))

    h1 = pl.pallas_call(
        _compressor_l1_kernel,
        out_shape=jax.ShapeDtypeStruct((B_PAD, HID1_PAD), jnp.bfloat16),
        grid_spec=pltpu.PrefetchScalarGridSpec(
            num_scalar_prefetch=0,
            grid=(nj, nk),
            in_specs=[
                pl.BlockSpec((B_PAD, FLAT_PAD), lambda j, k: (0, 0)),  # x resident
                pl.BlockSpec((TK, TN), lambda j, k: (k, j)),           # w1 streamed
                pl.BlockSpec((1, HID1_PAD), lambda j, k: (0, 0)),      # b1 resident
            ],
            out_specs=pl.BlockSpec((B_PAD, TN), lambda j, k: (0, j)),
            scratch_shapes=[pltpu.VMEM((B_PAD, TN), jnp.float32)]),
        compiler_params=pltpu.CompilerParams(
            # Production: raise to ~100 MiB on v5e/v6e; keep <= ~48 MiB on v7x.
            dimension_semantics=("parallel", "arbitrary"),
            vmem_limit_bytes=48 << 20),
        cost_estimate=cost1,
    )(x, w1, b1)

    vmem = pl.BlockSpec(memory_space=pltpu.MemorySpace.VMEM)
    tail_inputs = (
        h1, z_vae_p, w2, prepped["b2"], prepped["w3"], prepped["b3"],
        prepped["zw1_vae"], prepped["zw1_cond"], prepped["zb1"],
        prepped["zw2"], prepped["zb2"], prepped["zw3"], prepped["zb3"],
    )
    cost2 = pl.CostEstimate(
        flops=2 * B_PAD * (HID1_PAD * HID2 + HID2 * COND_LATENT
                           + CONCAT * ZD1 + ZD1 * ZD2 + ZD2 * VAE_LATENT),
        transcendentals=0,
        bytes_accessed=int(sum(int(a.size) * a.dtype.itemsize
                               for a in tail_inputs) + B_PAD * OUT_W * 4))

    out = pl.pallas_call(
        _cvae_tail_kernel,
        out_shape=jax.ShapeDtypeStruct((B_PAD, OUT_W), jnp.float32),
        in_specs=[vmem] * len(tail_inputs),
        out_specs=vmem,
        compiler_params=pltpu.CompilerParams(vmem_limit_bytes=48 << 20),
        cost_estimate=cost2,
    )(*tail_inputs)

    z_cond = out[:B, :COND_LATENT]
    z = out[:B, COND_LATENT:COND_LATENT + VAE_LATENT]
    return z_cond, z


# --------------------------------------------------------------------------
# Synthetic parameters / pure-JAX reference
# --------------------------------------------------------------------------
def init_params(key):
    """Deterministic synthetic weights (PyTorch nn.Linear shapes, transposed
    to (in, out)).  z_dnn layer-1 weight is stored only as its split pieces."""
    ks = jax.random.split(key, 6)
    s = 0.05

    def lin(k, fan_in, fan_out):
        kw, kb = jax.random.split(k)
        w = jax.random.normal(kw, (fan_in, fan_out), jnp.float32) * s
        b = jax.random.normal(kb, (1, fan_out), jnp.float32) * s
        return w, b

    w1, b1 = lin(ks[0], FLAT_DIM, HID1)
    w2, b2 = lin(ks[1], HID1, HID2)
    w3, b3 = lin(ks[2], HID2, COND_LATENT)
    zw1, zb1 = lin(ks[3], CONCAT, ZD1)
    zw2, zb2 = lin(ks[4], ZD1, ZD2)
    zw3, zb3 = lin(ks[5], ZD2, VAE_LATENT)
    return {
        "w1": w1, "b1": b1, "w2": w2, "b2": b2, "w3": w3, "b3": b3,
        "zw1_vae": zw1[:VAE_LATENT, :],     # rows multiplying z_vae
        "zw1_cond": zw1[VAE_LATENT:, :],    # rows multiplying z_condition
        "zb1": zb1, "zw2": zw2, "zb2": zb2, "zw3": zw3, "zb3": zb3,
    }


def reference_forward(cross_attn_wts, z_vae, p):
    """Pure-JAX reference mirroring the PyTorch forward head (with the same
    bf16 storage points as the kernel for a tight comparison)."""
    bf = lambda a: a.astype(jnp.bfloat16).astype(jnp.float32)
    x = cross_attn_wts.reshape(cross_attn_wts.shape[0], -1)
    h = jnp.maximum(bf(x) @ bf(p["w1"]) + p["b1"], 0.0)
    h = jnp.maximum(bf(h) @ bf(p["w2"]) + p["b2"], 0.0)
    z_cond = h @ p["w3"] + p["b3"]
    zw1 = jnp.concatenate([p["zw1_vae"], p["zw1_cond"]], axis=0)
    z_concat = jnp.concatenate([z_vae, z_cond], axis=1)
    h1 = z_concat @ zw1 + p["zb1"]
    h2 = h1 @ p["zw2"] + p["zb2"]
    z = h2 @ p["zw3"] + p["zb3"]
    return z_cond, z


if __name__ == "__main__":
    key = jax.random.PRNGKey(0)
    k_param, k_attn, k_zvae = jax.random.split(key, 3)
    params = init_params(k_param)
    prepped = prepare_params(params)       # one-time model-load prep

    # TODO(synk): SmilesVAE.forward_encoder (pretrained GRU encoder) and
    # DockingScorePredictor (pretrained cross-attention transformer) are
    # external modules not defined in the source; their outputs (z_vae and
    # layer-0 cross_attn_wts) are supplied directly as kernel inputs.
    z_vae = jax.random.normal(k_zvae, (BATCH, VAE_LATENT), jnp.float32)
    cross_attn_wts = jax.nn.softmax(
        jax.random.normal(k_attn, (BATCH, SMILES_MAX_LEN, AF2_MAX_LEN),
                          jnp.float32), axis=-1)

    z_cond, z = jax.block_until_ready(
        decoder_only_cvae_head(cross_attn_wts, z_vae, prepped))

    # TODO(synk): SmilesVAE.forward_decoder (teacher-forced GRU recon loss) is
    # external/pretrained; the kernel returns the latent z that feeds it.

    with jax.default_matmul_precision("highest"):
        z_cond_ref, z_ref = reference_forward(cross_attn_wts, z_vae, params)

    assert jnp.allclose(z_cond, z_cond_ref, atol=2e-3, rtol=2e-2), (
        float(jnp.max(jnp.abs(z_cond - z_cond_ref))))
    assert jnp.allclose(z, z_ref, atol=2e-3, rtol=2e-2), (
        float(jnp.max(jnp.abs(z - z_ref))))
    print("KERNEL_OK")
</pallas_src>

<mosaic_0001>
module attributes {stable_mosaic.version = 11 : i64} {
  func.func @_compressor_l1_kernel(%arg0: i32, %arg1: i32, %arg2: memref<8x256xbf16, #tpu.memory_space<vmem>>, %arg3: memref<128x128xbf16, #tpu.memory_space<vmem>>, %arg4: memref<1x256xf32, #tpu.memory_space<vmem>>, %arg5: memref<8x128xbf16, #tpu.memory_space<vmem>>, %arg6: memref<8x128xf32, #tpu.memory_space<vmem>>) attributes {dimension_semantics = [#tpu.dimension_semantics<parallel>, #tpu.dimension_semantics<arbitrary>], iteration_bounds = array<i64: 2, 2>, scalar_prefetch = 0 : i64, scratch_operands = 1 : i64, tpu.core_type = #tpu.core_type<tc>, window_params = [{pipeline_mode = #tpu.pipeline_mode<synchronous>, transform_indices = @transform_0, window_bounds = array<i64: 8, 256>}, {transform_indices = @transform_1, window_bounds = array<i64: 128, 128>}, {pipeline_mode = #tpu.pipeline_mode<synchronous>, transform_indices = @transform_2, window_bounds = array<i64: 1, 256>}, {transform_indices = @transform_3, window_bounds = array<i64: 8, 128>}]} {
    %c0_i32 = arith.constant 0 : i32
    %0 = arith.cmpi eq, %arg1, %c0_i32 : i32
    %1 = arith.extui %0 : i1 to i32
    %c0_i32_0 = arith.constant 0 : i32
    %2 = arith.cmpi ne, %1, %c0_i32_0 : i32
    scf.if %2 {
      %cst_8 = arith.constant 0.000000e+00 : f32
      %15 = vector.broadcast %cst_8 : f32 to vector<8x128xf32>
      %c0_9 = arith.constant 0 : index
      %c0_10 = arith.constant 0 : index
      %16 = vector.load %arg6[%c0_9, %c0_10] : memref<8x128xf32, #tpu.memory_space<vmem>>, vector<8x128xf32>
      tpu.vector_store %arg6[%c0_9, %c0_10], %15 {strides = array<i32>} : memref<8x128xf32, #tpu.memory_space<vmem>>, vector<8x128xf32>,
    } else {
    }
    %c128_i32 = arith.constant 128 : i32
    %3 = arith.muli %arg1, %c128_i32 : i32
    %4 = tpu.assume_multiple %3, 128 : i32
    %c0 = arith.constant 0 : index
    %c0_1 = arith.constant 0 : index
    %5 = vector.load %arg6[%c0, %c0_1] : memref<8x128xf32, #tpu.memory_space<vmem>>, vector<8x128xf32>
    %c0_2 = arith.constant 0 : index
    %6 = arith.index_cast %4 : i32 to index
    %7 = vector.load %arg2[%c0_2, %6] : memref<8x256xbf16, #tpu.memory_space<vmem>>, vector<8x128xbf16>
    %c0_3 = arith.constant 0 : index
    %c0_4 = arith.constant 0 : index
    %8 = vector.load %arg3[%c0_3, %c0_4] : memref<128x128xbf16, #tpu.memory_space<vmem>>, vector<128x128xbf16>
    %cst = arith.constant dense<0.000000e+00> : vector<8x128xf32>
    %9 = tpu.matmul %7, %8, %cst {dimension_numbers = #tpu.dot_dimension_numbers<[1], [0], [0], [1], [0, 0, 1, 1], [], []>} : vector<8x128xbf16>, vector<128x128xbf16>, vector<8x128xf32> -> vector<8x128xf32>
    %10 = arith.addf %5, %9 : vector<8x128xf32>
    %c0_5 = arith.constant 0 : index
    %c0_6 = arith.constant 0 : index
    %11 = vector.load %arg6[%c0_5, %c0_6] : memref<8x128xf32, #tpu.memory_space<vmem>>, vector<8x128xf32>
    tpu.vector_store %arg6[%c0_5, %c0_6], %10 {strides = array<i32>} : memref<8x128xf32, #tpu.memory_space<vmem>>, vector<8x128xf32>,
    %c1_i32 = arith.constant 1 : i32
    %12 = arith.cmpi eq, %arg1, %c1_i32 : i32
    %13 = arith.extui %12 : i1 to i32
    %c0_i32_7 = arith.constant 0 : i32
    %14 = arith.cmpi ne, %13, %c0_i32_7 : i32
    scf.if %14 {
      %c128_i32_8 = arith.constant 128 : i32
      %15 = arith.muli %arg0, %c128_i32_8 : i32
      %16 = tpu.assume_multiple %15, 128 : i32
      %c0_9 = arith.constant 0 : index
      %17 = arith.index_cast %16 : i32 to index
      %18 = vector.load %arg4[%c0_9, %17] : memref<1x256xf32, #tpu.memory_space<vmem>>, vector<1x128xf32>
      %c0_10 = arith.constant 0 : index
      %c0_11 = arith.constant 0 : index
      %19 = vector.load %arg6[%c0_10, %c0_11] : memref<8x128xf32, #tpu.memory_space<vmem>>, vector<8x128xf32>
      %20 = vector.broadcast %18 : vector<1x128xf32> to vector<8x128xf32>
      %21 = arith.addf %19, %20 : vector<8x128xf32>
      %cst_12 = arith.constant 0.000000e+00 : f32
      %22 = vector.broadcast %cst_12 : f32 to vector<8x128xf32>
      %23 = arith.maximumf %21, %22 : vector<8x128xf32>
      %24 = arith.truncf %23 : vector<8x128xf32> to vector<8x128xbf16>
      %c0_13 = arith.constant 0 : index
      %c0_14 = arith.constant 0 : index
      %25 = vector.load %arg5[%c0_13, %c0_14] : memref<8x128xbf16, #tpu.memory_space<vmem>>, vector<8x128xbf16>
      tpu.vector_store %arg5[%c0_13, %c0_14], %24 {strides = array<i32>} : memref<8x128xbf16, #tpu.memory_space<vmem>>, vector<8x128xbf16>,
    } else {
    }
    return
  }
  func.func @transform_0(%arg0: i32, %arg1: i32) -> (i32, i32) {
    %c0_i32 = arith.constant 0 : i32
    %c0_i32_0 = arith.constant 0 : i32
    %c0_i32_1 = arith.constant 0 : i32
    return %c0_i32, %c0_i32_0 : i32, i32
  }
  func.func @transform_1(%arg0: i32, %arg1: i32) -> (i32, i32) {
    %c0_i32 = arith.constant 0 : i32
    return %arg1, %arg0 : i32, i32
  }
  func.func @transform_2(%arg0: i32, %arg1: i32) -> (i32, i32) {
    %c0_i32 = arith.constant 0 : i32
    %c0_i32_0 = arith.constant 0 : i32
    %c0_i32_1 = arith.constant 0 : i32
    return %c0_i32, %c0_i32_0 : i32, i32
  }
  func.func @transform_3(%arg0: i32, %arg1: i32) -> (i32, i32) {
    %c0_i32 = arith.constant 0 : i32
    %c0_i32_0 = arith.constant 0 : i32
    return %c0_i32, %arg0 : i32, i32
  }
}

</mosaic_0001>

<bundles_post_ra>
// kernel: tpu_custom_call.1
= control target key start
LH: loop header
LB: loop body
LE: loop exit
PB: predicated region body
PF: predicated region fallthrough
CT: control target
= control target key end

     0   :  { %s1156_s0 = inlined_call_operand.hbm [shape: bf16[8,256], index: 0, kind: input, shape index: {}]   ;;  %s1157_s1 = inlined_call_operand.hbm [shape: bf16[256,256], index: 1, kind: input, shape index: {}]   ;;  %s1158_s2 = inlined_call_operand.vmem [shape: f32[1,256], index: 2, kind: input, shape index: {}]   ;;  %s1159_s3 = inlined_call_operand.hbm [shape: bf16[8,256], index: 3, kind: output, shape index: {}]  }
   0x1   :  { %1171 = sst [smem:[#allocation17_spill]] %s1156_s0 }
   0x2   :  { %8 = vsyncpa [#allocation4], 0 }
   0x3   :  { %9 = vsyncpa [#allocation7], 0 }
   0x4   :  { %11 = vsyncpa [#allocation7 + $0x1], 0 }
   0x5   :  { %12 = vsyncpa [#allocation5], 0 }
   0x6   :  { %14 = vsyncpa [#allocation5 + $0x1], 0  ;;  %s873_s12 = smov 0   ;;  %s875_s13 = smov 0  }
   0x7   :  { %s877_s14 = smov 0   ;;  %s879_s15 = smov 0  }
   0x8   :  { %s881_s16 = smov 0   ;;  %s883_s17 = smov 0  }
   0x9   :  { %s885_s18 = smov 0   ;;  %s887_s19 = smov 0  }
   0xa   :  { %s889_s20 = smov 0   ;;  %s891_s21 = smov 0  }
   0xb   :  { %s893_s22 = smov 0  }
   0xc LB: > { %1172 = sst [smem:[#allocation12_spill]] %s802_s12  ;;  %s470_s23 = sadd.s32 4294967295, %s842_s22   ;;  %s842_s22 = sphi %s893_s22, %s20_s22   ;;  %s838_s21 = sphi %s891_s21, %s1206_s21   ;;  %s834_s20 = sphi %s889_s20, %s1197_s20   ;;  %s830_s19 = sphi %s887_s19, %s1205_s19   ;;  %s826_s18 = sphi %s885_s18, %s1196_s18   ;;  %s822_s17 = sphi %s883_s17, %s1204_s17   ;;  %s818_s16 = sphi %s881_s16, %s1203_s16   ;;  %s814_s15 = sphi %s879_s15, %s1202_s15   ;;  %s810_s14 = sphi %s877_s14, %s1201_s14   ;;  %s806_s13 = sphi %s875_s13, %s1200_s13   ;;  %s802_s12 = sphi %s873_s12, %s1199_s12  }
   0xd   : > { %1173 = sst [smem:[#allocation13_spill]] %s834_s20  ;;  %s471_s24 = sadd.s32 4294967294, %s842_s22  }
   0xe   : > { %p69_p0 = scmp.ne.s32.totalorder %s822_s17, %s818_s16  ;;  %p70_p1 = scmp.eq.s32.totalorder %s842_s22, 0 }
   0xf   : > { %p75_p2 = scmp.ne.s32.totalorder %s818_s16, %s814_s15  ;;  %p933_p3 = scmp.eq.s32.totalorder %s470_s23, 0 }
  0x10   : > { %p938_p4 = por %p70_p1, %p69_p0  ;;  %p119_p5 = scmp.ne.s32.totalorder %s810_s14, %s806_s13 }
  0x11   : > { %s1174_s26 = scalar_select %p933_p3, 1, 0 }
  0x12   : > { %p946_p6 = por %p933_p3, %p75_p2  ;;  %p120_p7 = scmp.eq.s32.totalorder %s470_s23, 3 }
  0x13   : > { %p125_p8 = scmp.ne.s32.totalorder %s806_s13, %s802_s12  ;;  %p126_p9 = scmp.eq.s32.totalorder %s471_s24, 3 }
  0x14   : > { %s1176_s29 = scalar_select %p946_p6, 1, 0 }
  0x15   : > { %p952_p10 = por %p120_p7, %p119_p5  ;;  %p472_p11 = scmp.ge.s32.totalorder %s842_s22, 1 }
  0x16   : > { %p957_p12 = por %p126_p9, %p125_p8  ;;  %p133_p13 = scmp.lt.s32.totalorder %s842_s22, 5 }
  0x17   : > { %s1177_s30 = scalar_select %p952_p10, 1, 0 }
  0x18   : > { %s1178_s4 = scalar_select %p957_p12, 1, 0 }
  0x19   : > { %p962_p0 = pnand %p472_p11, %p133_p13  ;;  %s844_s6 = smov [#allocation3]  }
  0x1a   : > { %1179 = sst [smem:[#allocation14_spill]] %s1178_s4  ;;  %s146_s7 = sshll.u32 %s844_s6, 4  ;;  %s147_s7 = int_to_ptr.vmem [resolvable:$true] %s146_s7 }
  0x1b   : > { %s1180_s5 = scalar_select %p962_p0, 1, 0 }
  0x1c   : > { %p539_p1 = pneg %p962_p0  ;;  %p552_p2 = scmp.lt.s32.totalorder %s842_s22, 4 }
  0x1d   : > { %s1183_s0 = sld [smem:[#allocation17_spill]] }
  0x1e   : > { %p971_p5 = pnand %p539_p1, %p933_p3  ;;  %p977_p7 = pnand %p552_p2, %p938_p4 }
  0x20   : > { %s1182_s9 = scalar_select %p977_p7, 1, 0 }
  0x21   : > { %p660_p9 = pneg %p971_p5 }
  0x23   : > { %s658_s15 = scalar_lea.hbm %s1183_s0, 128 }
  0x24   : > { %p659_p8 = scmp.ne.s32.totalorder %s1183_s0, %s658_s15  ;;  %p665_p1 = scmp.lt.u32.totalorder %s658_s15, %s1183_s0 }
  0x26   : > { %p661_p11 = pnand %p660_p9, %p659_p8 }
  0x28   : > { %p662_p13 = pneg %p661_p11 }
  0x2a   : > { %p667_p4 = pnand %p665_p1, %p662_p13 }
  0x2c   : > { %670 = shalt.err (!%p667_p4)
}
  0x2d   : > { %s671_s28 = scalar_lea.vmem %s147_s7, 128  ;;  %p679_p6 = scmp.lt.s32.totalorder %s147_s7, %s147_s7 }
  0x2e   : > { %p672_p2 = scmp.ne.s32.totalorder %s147_s7, %s671_s28  ;;  %p680_p3 = scmp.lt.s32.totalorder %s671_s28, %s671_s28 }
  0x30   : > { %p674_p12 = pnand %p672_p2, %p660_p9  ;;  %p681_p0 = por %p680_p3, %p679_p6 }
  0x32   : > { %p675_p10 = pneg %p674_p12 }
  0x34   : > { %p682_p7 = pnand %p681_p0, %p675_p10 }
  0x36   : > { %685 = shalt.err (!%p682_p7)
}
  0x37   : > { %542 = dma.hbm_to_vmem [thread:$0]  (!%p971_p5), %s1183_s0, 128, %s147_s7, [#allocation4]  }
  0x38   : > { %s29_s25 = sadd.s32 1, %s834_s20  ;;  %s32_s15 = sadd.s32 1, %s838_s21 }
  0x39   : > { %p30_p12 = scmp.ge.s32.totalorder %s29_s25, 2  ;;  %s160_s23 = sand.u32 1, %s822_s17  }
  0x3a   : > { %s475_s24 = sshll.u32 %s160_s23, 6  ;;  %s501_s6 = sshll.u32 %s834_s20, 5 }
  0x3b   : > { %s1208_s25 = smov (%p30_p12, %s29_s25), 0  ;;  %s1210_s15 = smov (!%p30_p12, %s32_s15), %s838_s21 }
  0x3c   : > { %1184 = sst [smem:[#allocation15_spill]] %s1208_s25  ;;  %s57_s8 = ssub.s32 %s834_s20, %s1208_s25 }
  0x3d   : > { %p34_p3 = scmp.ge.s32.totalorder %s1210_s15, 2  ;;  %s170_s28 = sadd.s32 %s838_s21, %s501_s6 }
  0x3e   : > { %s164_s7 = scalar_lea.vmem [#allocation6], %s475_s24  ;;  %s478_s11 = sshll.u32 %s170_s28, 6 }
  0x3f   : > { %s173_s10 = sshll.u32 %s164_s7, 4  ;;  %s1212_s15 = smov (%p34_p3, %s1210_s15), 0  ;;  %s1009_s10 = int_to_ptr.vmem [resolvable:$true] %s173_s10 }
  0x40   : > { %1185 = sst [smem:[#allocation16_spill]] %s1212_s15  ;;  %s58_s27 = ssub.s32 %s838_s21, %s1212_s15 }
  0x41   : > { %s1016_s12 = scalar_lea.hbm %s1157_s1, %s478_s11  ;;  %s59_s6 = sor.u32 %s58_s27, %s57_s8 }
  0x42   : > { %p107_p6 = scmp.eq.s32.totalorder %s58_s27, 0  ;;  %p60_p10 = scmp.eq.s32.totalorder %s59_s6, 0 }
  0x43   : > { %s1186_s24 = sadd.s32 1, %s810_s14  ;;  %s1187_s25 = sadd.s32 1, %s822_s17 }
  0x44   : > { %s1021_s7 = scalar_select %p107_p6, %s810_s14, %s1186_s24  }
  0x45   : > { %s1026_s28 = scalar_select %p60_p10, %s822_s17, %s1187_s25  }
  0x46   : > { %s1028_s20 = scalar_lea.sflag [#allocation7], %s160_s23  ;;  %s686_s15 = scalar_lea.hbm %s1016_s12, 1024 }
  0x47   : > { %p687_p0 = scmp.ne.s32.totalorder %s1016_s12, %s686_s15  ;;  %p1188_p5 = scmp.ne.s32.totalorder %s1182_s9, 0 }
  0x48   : > { %s691_s27 = scalar_lea.hbm %s1157_s1, 4096  ;;  %p692_p11 = scmp.lt.u32.totalorder %s1016_s12, %s1157_s1 }
  0x49   : > { %p688_p7 = pneg %p1188_p5  ;;  %p693_p13 = scmp.lt.u32.totalorder %s691_s27, %s686_s15 }
  0x4a   : > { %p695_p4 = scmp.lt.u32.totalorder %s686_s15, %s1016_s12 }
  0x4b   : > { %p689_p8 = pnand %p688_p7, %p687_p0  ;;  %p694_p1 = por %p693_p13, %p692_p11 }
  0x4d   : > { %p690_p9 = pneg %p689_p8  ;;  %p696_p2 = por %p695_p4, %p694_p1 }
  0x4f   : > { %p697_p12 = pnand %p696_p2, %p690_p9 }
  0x51   : > { %700 = shalt.err (!%p697_p12)
}
  0x52   : > { %s701_s25 = scalar_lea.vmem %s1009_s10, 1024  ;;  %s845_s23 = smov [#allocation6]  }
  0x53   : > { %p702_p3 = scmp.ne.s32.totalorder %s1009_s10, %s701_s25  ;;  %s706_s6 = sshll.u32 %s845_s23, 4  ;;  %s707_s6 = int_to_ptr.vmem [resolvable:$false] %s706_s6 }
  0x54   : > { %s708_s24 = scalar_lea.vmem %s707_s6, 2048  ;;  %p709_p0 = scmp.lt.s32.totalorder %s1009_s10, %s707_s6 }
  0x55   : > { %p704_p6 = pnand %p702_p3, %p688_p7  ;;  %p710_p8 = scmp.lt.s32.totalorder %s708_s24, %s701_s25 }
  0x57   : > { %p705_p10 = pneg %p704_p6  ;;  %p711_p11 = por %p710_p8, %p709_p0 }
  0x59   : > { %p712_p13 = pnand %p711_p11, %p705_p10 }
  0x5b   : > { %715 = shalt.err (!%p712_p13)
}
  0x5c   : > { %s846_s15 = smov 128   ;;  %s847_s0 = smov 64  }
  0x5d   : > { %s848_s4 = smov 4   ;;  %p1189_p7 = scmp.ne.s32.totalorder %s1180_s5, 0 }
  0x5e   : > { %546 = dma.hbm_to_vmem [thread:$0]  (!%p1188_p5), %s1016_s12, 1024, %s1009_s10, %s1028_s20, %s846_s15, %s847_s0, %s848_s4  }
  0x5f   : > { %185 = sbr.rel (%p1189_p7) target bundleno = 403 (0x193), region = 32  ;;  %p1190_p9 = scmp.ne.s32.totalorder (!%p1189_p7), %s1174_s26, 0 }
  0x66   : > { %789 = dma.done.wait (%p1190_p9), [#allocation4], 128  }
  0x67   : > { %791 = vsyncadd (%p1190_p9), [#allocation4], 4294967168  ;;  %s191_s27 = sand.u32 1, %s818_s16   ;;  %p1191_p1 = scmp.ne.s32.totalorder %s1176_s29, 0 }
  0x68   : > { %s481_s8 = sshll.u32 %s191_s27, 6  ;;  %s192_s11 = scalar_lea.sflag [#allocation7], %s191_s27 }
  0x69   : > { %s1063_s25 = scalar_lea.vmem [#allocation6], %s481_s8 }
  0x6a   : > { %793 = dma.done.wait (%p1191_p1), %s192_s11, 1024  }
  0x6b   : > { %795 = vsyncadd (%p1191_p1), %s192_s11, 4294966272  ;;  %s215_s12 = sand.u32 1, %s806_s13   ;;  %p483_p5 = scmp.ne.s32.totalorder %s826_s18, 0 }
  0x6c   : > { %s1072_s20 = sshll.u32 %s215_s12, 2  ;;  %v849_v0 = vmov (!%p483_p5), 0.0  }
  0x6d   : > { %s217_s26 = scalar_lea.vmem [#allocation8], %s1072_s20  ;;  %223 = sbr.rel (%p483_p5) target bundleno = 116 (0x74), region = 44  ;;  %224 = vst [vmem:[#allocation2] sm:$0xff] (!%p483_p5), %v849_v0 }
  0x74 PF: > { %v650_v1 = vld [vmem:[%s1063_s25] sm:$0xff]   ;;  %v850_v2 = vmov 0.0   ;;  %v651_v3 = vld [vmem:[%s1063_s25 + $0x8] sm:$0xff]   ;;  %vm851_vm0 = vmmov 0   ;;  %v652_v4 = vld [vmem:[%s1063_s25 + $0x10] sm:$0xff]   ;;  %s484_s29 = sshll.u32 %s826_s18, 7 }
  0x75   : > { %511 = vmatprep.subr.bf16.mxu0 %v850_v2  ;;  %527 = vmatprep.mubr.msk.bf16.mxu0 %vm851_vm0, %v850_v2  ;;  %v653_v5 = vld [vmem:[%s1063_s25 + $0x18] sm:$0xff]   ;;  %v654_v6 = vld [vmem:[%s1063_s25 + $0x20] sm:$0xff]   ;;  %v655_v7 = vld [vmem:[%s1063_s25 + $0x28] sm:$0xff]   ;;  %s227_s5 = sshra.s32 %s484_s29, 7  ;;  %p494_p4 = scmp.ne.s32.totalorder %s826_s18, 1 }
  0x76   : > { %512 = vmatpush3.bf16.msra.mxu0 %v650_v1  ;;  %v656_v8 = vld [vmem:[%s1063_s25 + $0x30] sm:$0xff]   ;;  %s485_s9 = sshll.u32 %s227_s5, 2  ;;  %v657_v9 = vld [vmem:[%s1063_s25 + $0x38] sm:$0xff]   ;;  %s495_s23 = sshll.u32 (!%p494_p4), %s830_s19, 7 }
  0x77   : > { %513 = vmatprep.subr.bf16.mxu0 %v850_v2  ;;  %s230_s10 = scalar_lea.vmem [#allocation3], %s485_s9  ;;  %v226_v11 = vld [vmem:[#allocation2] sm:$0xff]  ;;  %s343_s6 = sshra.s32 (!%p494_p4), %s495_s23, 7 }
  0x78   : > { %v231_v10 = vld [vmem:[%s230_s10] sm:$0xf]  ;;  %s345_s0 = scalar_lea.vmem (!%p494_p4), %s1158_s2, %s343_s6 }
  0x79   : > { %v496_v18 = vld [vmem:[%s345_s0] ss:$0 sm:$0xff] (!%p494_p4) }
  0x7a   : > { %514 = vmatpush3.bf16.msra.mxu0 %v651_v3 }
  0x7b   : > { %515 = vmatprep.subr.bf16.mxu0 %v850_v2 }
  0x7e   : > { %516 = vmatpush3.bf16.msra.mxu0 %v652_v4 }
  0x7f   : > { %517 = vmatprep.subr.bf16.mxu0 %v850_v2 }
  0x82   : > { %518 = vmatpush3.bf16.msra.mxu0 %v653_v5 }
  0x83   : > { %519 = vmatprep.subr.bf16.mxu0 %v850_v2 }
  0x86   : > { %520 = vmatpush3.bf16.msra.mxu0 %v654_v6 }
  0x87   : > { %521 = vmatprep.subr.bf16.mxu0 %v850_v2 }
  0x8a   : > { %522 = vmatpush3.bf16.msra.mxu0 %v655_v7 }
  0x8b   : > { %523 = vmatprep.subr.bf16.mxu0 %v850_v2 }
  0x8e   : > { %524 = vmatpush3.bf16.msra.mxu0 %v656_v8 }
  0x8f   : > { %525 = vmatprep.subr.bf16.mxu0 %v850_v2 }
  0x92   : > { %526 = vmatpush3.bf16.msra.mxu0 %v657_v9 }
  0x95   : > { %528 = vmatmul.mubr.bf16.vlgmr.msra.gmra.mrb[0].mxu0 %v231_v10 }
 0x165   : > { %341 = sbr.rel (%p494_p4) target bundleno = 378 (0x17a), region = 48 }
 0x168   : > { %v330_v12 = vpop.f32.mrb[0].mxu0 }
 0x169   : > { %v336_v13 = vadd.f32 %v330_v12, %v226_v11  ;;  %v529_v14 = vpop.f32.mrb[1].mxu0 }
 0x16a   : > { %v333_v15 = vpop.f32.mrb[2].mxu0 }
 0x16b   : > { %337 = vst [vmem:[#allocation2] sm:$0xff] %v336_v13  ;;  %v530_v16 = vpop.f32.mrb[3].mxu0 }
 0x172   : > { %v347_v17 = vld [vmem:[#allocation2] sm:$0xff] }
 0x173   : > { %v354_v19 = vadd.f32 %v496_v18, %v347_v17 }
 0x175   : > { %v355_v20 = vmax.f32 %v354_v19, 0.0 }
 0x177   : > { %v356_v21 = vpack.c.bf16 %v355_v20, %v355_v20 }
 0x179   : > { %357 = vst [vmem:[%s217_s26] sm:$0xf] %v356_v21 }
 0x17a PF: > { %s498_s18 = sshll.u32 %s830_s19, 6  ;;  %s372_s11 = sshll.u32 %s217_s26, 4  ;;  %s373_s11 = int_to_ptr.vmem [resolvable:$true] %s372_s11 }
 0x17b   : > { %s1096_s8 = scalar_lea.hbm %s1159_s3, %s498_s18  ;;  %s359_s25 = scalar_lea.sflag [#allocation5], %s215_s12 }
 0x17c   : > { %s716_s29 = scalar_lea.vmem %s373_s11, 64  ;;  %p1192_p12 = scmp.ne.s32.totalorder %s1177_s30, 0 }
 0x17d   : > { %p717_p2 = scmp.ne.s32.totalorder %s373_s11, %s716_s29  ;;  %s852_s5 = smov [#allocation8]  }
 0x17e   : > { %s720_s9 = sshll.u32 %s852_s5, 4  ;;  %s721_s9 = int_to_ptr.vmem [resolvable:$false] %s720_s9 }
 0x17f   : > { %p718_p3 = pnand %p717_p2, %p1192_p12  ;;  %s722_s10 = scalar_lea.vmem %s721_s9, 128 }
 0x180   : > { %p723_p10 = scmp.lt.s32.totalorder %s373_s11, %s721_s9  ;;  %p724_p0 = scmp.lt.s32.totalorder %s722_s10, %s716_s29 }
 0x181   : > { %p719_p6 = pneg %p718_p3 }
 0x182   : > { %p725_p8 = por %p724_p0, %p723_p10 }
 0x184   : > { %p726_p11 = pnand %p725_p8, %p719_p6 }
 0x186   : > { %729 = shalt.err (!%p726_p11)
}
 0x187   : > { %s730_s19 = scalar_lea.hbm %s1096_s8, 64  ;;  %s734_s26 = scalar_lea.hbm %s1159_s3, 128 }
 0x188   : > { %p731_p13 = scmp.ne.s32.totalorder %s1096_s8, %s730_s19  ;;  %p735_p1 = scmp.lt.u32.totalorder %s1096_s8, %s1159_s3 }
 0x189   : > { %p736_p5 = scmp.lt.u32.totalorder %s734_s26, %s730_s19  ;;  %p738_p2 = scmp.lt.u32.totalorder %s730_s19, %s1096_s8 }
 0x18a   : > { %p732_p7 = pnand %p731_p13, %p1192_p12 }
 0x18b   : > { %p737_p4 = por %p736_p5, %p735_p1 }
 0x18c   : > { %p733_p9 = pneg %p732_p7 }
 0x18d   : > { %p739_p3 = por %p738_p2, %p737_p4 }
 0x18f   : > { %p740_p6 = pnand %p739_p3, %p733_p9 }
 0x191   : > { %743 = shalt.err (!%p740_p6)
}
 0x192   : > { %537 = dma.vmem_to_hbm [thread:$0]  (%p1192_p12), %s373_s11, 64, %s1096_s8, %s359_s25  }
 0x193 PF: > { %s1193_s24 = sld [smem:[#allocation12_spill]]  ;;  %s1194_s15 = sld [smem:[#allocation14_spill]] }
 0x194   : > { %p554_p10 = scmp.ge.s32.totalorder %s842_s22, 2 }
 0x199   : > { %s384_s0 = sand.u32 1, %s1193_s24   ;;  %p1195_p0 = scmp.ne.s32.totalorder %s1194_s15, 0 }
 0x19a   : > { %s385_s18 = scalar_lea.sflag [#allocation5], %s384_s0 }
 0x19b   : > { %p548_p8 = pnand %p554_p10, %p1195_p0 }
 0x19d   : > { %797 = dma.done.wait (!%p548_p8), %s385_s18, 64  }
 0x19e   : > { %799 = vsyncadd (!%p548_p8), %s385_s18, 4294967232  ;;  %s20_s22 = sadd.s32 1, %s842_s22   ;;  %s1196_s18 = sld [smem:[#allocation13_spill]] }
 0x19f   : > { %p17_p11 = scmp.ge.s32.totalorder %s20_s22, 6   ;;  %s1197_s20 = sld [smem:[#allocation15_spill]] }
 0x1a0   : > { %s1198_s30 = sld [smem:[#allocation16_spill]]  ;;  %s1199_s12 = smov %s806_s13 }
 0x1a1   : > { %s1200_s13 = smov %s810_s14  ;;  %s1201_s14 = smov %s1021_s7 }
 0x1a2   : > { %s1202_s15 = smov %s818_s16  ;;  %s1203_s16 = smov %s822_s17 }
 0x1a3   : > { %s1204_s17 = smov %s1026_s28  ;;  %s1205_s19 = smov %s838_s21 }
 0x1a4   :  { %19 = sbr.rel (!%p17_p11) target bundleno = 12 (0xc), region = 92 }
 0x1a6   : > { %s1206_s21 = smov %s1198_s30 }
 0x1ab   :  { %390 = vsyncpa [#allocation4], 1 }
 0x1ac   :  { %392 = vsyncpa [#allocation4 + $0x1], 1 }
 0x1ad   :  { %393 = vsyncpa [#allocation7], 1 }
 0x1ae   :  { %395 = vsyncpa [#allocation7 + $0x1], 1 }
 0x1af   :  { %396 = vsyncpa [#allocation5], 1 }
 0x1b0   :  { %398 = vsyncpa [#allocation5 + $0x1], 1 }

</bundles_post_ra>
